<compile_context>
chip_gen: v6e
topology: v6e:2x2x1
jax: 0.10.0
libtpu: 0.0.40
codegen_flags: <defaults>
</compile_context>

<pallas_src>
import functools

import jax
import jax.numpy as jnp
import numpy as np
from jax.experimental import pallas as pl
from jax.experimental.pallas import tpu as pltpu

EPS_LN = 1e-5    # LayerNorm eps (torch default used by the module)
EPS_OUT = 1e-6   # added after softplus


def _softplus(x):
    # numerically stable softplus (matches torch / jax.nn.softplus)
    return jnp.maximum(x, 0.0) + jnp.log1p(jnp.exp(-jnp.abs(x)))


def decoder_kernel(num_res, K, T, z_ref, win_ref, resw_ref, resv_ref,
                   wout_ref, out_ref):
    """One batch element: full [K*T, C] row slab through the whole decoder.

    z_ref    [K*T, D]    input rows (channels last -> lanes)
    win_ref  [D+1, N]    first 1x1 conv ([:D] weight, [D:] bias)
    resw_ref [R, N, N]   residual conv weights
    resv_ref [R, 4, N]   per-block vectors: bias, prelu a, gamma, beta
    wout_ref [N+1, F]    final 1x1 conv ([:N] weight, [N:] bias)
    out_ref  [K*T, F]
    """
    D = win_ref.shape[0] - 1
    N = win_ref.shape[1]
    rows = K * T

    x = z_ref[...]                                                   # [K*T, D]

    # first 1x1 conv: channel matmul (bias folded in as last weight row)
    h = jnp.dot(x, win_ref[:D, :],
                preferred_element_type=jnp.float32) + win_ref[D:, :]

    inv_cnt = 1.0 / float(T * N)
    for i in range(num_res):
        w = resw_ref[i]                                              # [N, N]
        v = resv_ref[i]                                              # [4, N]

        # Dropout(0.0) -> Conv1x1 -> PReLU
        y = jnp.dot(h, w, preferred_element_type=jnp.float32) + v[0:1, :]
        y = jnp.where(y >= 0, y, v[1:2, :] * y)

        # LayerNorm over (channel, time) per k.  Single pass: sum + sum-of-
        # squares, rsqrt on the EUP, gamma folded into the scale.
        y3 = y.reshape(K, T, N)                                      # cheap: lane dim unchanged
        s1 = jnp.sum(jnp.sum(y3, axis=2, keepdims=True), axis=1, keepdims=True)
        s2 = jnp.sum(jnp.sum(y3 * y3, axis=2, keepdims=True), axis=1, keepdims=True)
        mu = s1 * inv_cnt                                            # [K,1,1]
        var = s2 * inv_cnt - mu * mu
        scale = jax.lax.rsqrt(var + EPS_LN) * v[2:3, :][None]        # [K,1,N]
        yn = (y3 - mu) * scale + v[3:4, :][None]

        h = h + yn.reshape(rows, N)                                  # residual

    # final 1x1 conv to F channels + softplus + eps
    o = jnp.dot(h, wout_ref[:N, :],
                preferred_element_type=jnp.float32) + wout_ref[N:, :]
    out_ref[...] = _softplus(o) + EPS_OUT


def init_params(key, D, N, F, L):
    """Packed parameters. Conv weights stored as [Cin, Cout]."""
    R = L - 1
    k0, k1, k2, k3, k4, k5, k6 = jax.random.split(key, 7)

    w0 = jax.random.normal(k0, (D, N), jnp.float32) / np.sqrt(D)
    b0 = 0.1 * jax.random.normal(k1, (1, N), jnp.float32)
    w_in = jnp.concatenate([w0, b0], axis=0)                         # [D+1, N]

    kws = jax.random.split(k2, R)
    res_w = jnp.stack([jax.random.normal(kws[i], (N, N), jnp.float32) / np.sqrt(N)
                       for i in range(R)])                           # [R, N, N]

    res_b = 0.1 * jax.random.normal(k3, (R, 1, N), jnp.float32)      # conv bias
    res_a = jnp.full((R, 1, N), 0.25, jnp.float32)                   # PReLU a (torch default)
    res_g = 1.0 + 0.1 * jax.random.normal(k4, (R, 1, N), jnp.float32)  # LN weight
    res_be = 0.1 * jax.random.normal(k5, (R, 1, N), jnp.float32)     # LN bias
    res_v = jnp.concatenate([res_b, res_a, res_g, res_be], axis=1)   # [R, 4, N]

    wf = jax.random.normal(k6, (N, F), jnp.float32) / np.sqrt(N)
    bf = jnp.zeros((1, F), jnp.float32)
    w_out = jnp.concatenate([wf, bf], axis=0)                        # [N+1, F]

    return (w_in, res_w, res_v, w_out)


def decoder_forward(z, params):
    """z: [B, D, T, K] (torch NCHW).  Returns [B, T, F, K]."""
    w_in, res_w, res_v, w_out = params
    B, D, T, K = z.shape
    N = w_in.shape[1]
    F = w_out.shape[1]
    R = res_w.shape[0]
    rows = K * T

    # NCHW -> channels-last row slab [B, K*T, D] (single XLA re-layout).
    zk = jnp.transpose(z, (0, 3, 2, 1)).reshape(B, rows, D)

    kernel = functools.partial(decoder_kernel, R, K, T)
    out = pl.pallas_call(
        kernel,
        out_shape=jax.ShapeDtypeStruct((B, rows, F), jnp.float32),
        grid=(B,),
        in_specs=[
            pl.BlockSpec((None, rows, D), lambda b: (b, 0, 0)),
            pl.BlockSpec((D + 1, N), lambda b: (0, 0)),
            pl.BlockSpec((R, N, N), lambda b: (0, 0, 0)),
            pl.BlockSpec((R, 4, N), lambda b: (0, 0, 0)),
            pl.BlockSpec((N + 1, F), lambda b: (0, 0)),
        ],
        out_specs=pl.BlockSpec((None, rows, F), lambda b: (b, 0, 0)),
        compiler_params=pltpu.CompilerParams(
            dimension_semantics=("parallel",)),
    )(zk, w_in, res_w, res_v, w_out)

    # [B, K*T, F] -> [B, K, T, F] -> [B, T, F, K]  (module's required layout)
    return jnp.transpose(out.reshape(B, K, T, F), (0, 2, 3, 1))


def decoder_ref(z, params):
    """Pure-JAX reference mirroring the torch module exactly (f32 HIGHEST)."""
    w_in, res_w, res_v, w_out = params
    D = w_in.shape[0] - 1
    N = w_out.shape[0] - 1
    hi = jax.lax.Precision.HIGHEST

    w0, b0 = w_in[:D], w_in[D]
    h = jnp.einsum('bdtk,dn->bntk', z, w0, precision=hi) + b0[None, :, None, None]
    for i in range(res_w.shape[0]):
        w = res_w[i]
        b, a, g, be = res_v[i]
        y = jnp.einsum('bctk,cn->bntk', h, w, precision=hi) + b[None, :, None, None]
        y = jnp.where(y >= 0, y, a[None, :, None, None] * y)
        mu = jnp.mean(y, axis=(1, 2), keepdims=True)
        sig = jnp.sqrt(jnp.mean((y - mu) ** 2, axis=(1, 2), keepdims=True) + EPS_LN)
        y = (y - mu) / sig * g[None, :, None, None] + be[None, :, None, None]
        h = h + y
    wf, bf = w_out[:N], w_out[N]
    o = jnp.einsum('bctk,cf->bftk', h, wf, precision=hi) + bf[None, :, None, None]
    h2 = jnp.transpose(o, (0, 2, 1, 3))  # [B, T, F, K]
    return jax.nn.softplus(h2) + EPS_OUT


if __name__ == "__main__":
    # small shapes consistent with the module: z is [B, D, T, K]
    B, D, T, K = 2, 8, 8, 3
    N, F, L = 32, 16, 3

    key = jax.random.PRNGKey(0)
    kz, kp = jax.random.split(key)
    z = jax.random.normal(kz, (B, D, T, K), jnp.float32)
    params = init_params(kp, D, N, F, L)

    out = jax.block_until_ready(decoder_forward(z, params))
    assert out.shape == (B, T, F, K), out.shape

    ref = jax.block_until_ready(decoder_ref(z, params))
    np.testing.assert_allclose(np.asarray(out), np.asarray(ref),
                               rtol=1e-3, atol=1e-3)

    print("KERNEL_OK")
</pallas_src>

<mosaic_0001>
module attributes {stable_mosaic.version = 11 : i64} {
  func.func @decoder_kernel(%arg0: i32, %arg1: memref<1x24x8xf32, #tpu.memory_space<vmem>>, %arg2: memref<9x32xf32, #tpu.memory_space<vmem>>, %arg3: memref<2x32x32xf32, #tpu.memory_space<vmem>>, %arg4: memref<2x4x32xf32, #tpu.memory_space<vmem>>, %arg5: memref<33x16xf32, #tpu.memory_space<vmem>>, %arg6: memref<1x24x16xf32, #tpu.memory_space<vmem>>) attributes {dimension_semantics = [#tpu.dimension_semantics<parallel>], iteration_bounds = array<i64: 2>, scalar_prefetch = 0 : i64, scratch_operands = 0 : i64, tpu.core_type = #tpu.core_type<tc>, window_params = [{transform_indices = @transform_0, window_bounds = array<i64: 1, 24, 8>}, {pipeline_mode = #tpu.pipeline_mode<synchronous>, transform_indices = @transform_1, window_bounds = array<i64: 9, 32>}, {pipeline_mode = #tpu.pipeline_mode<synchronous>, transform_indices = @transform_2, window_bounds = array<i64: 2, 32, 32>}, {pipeline_mode = #tpu.pipeline_mode<synchronous>, transform_indices = @transform_3, window_bounds = array<i64: 2, 4, 32>}, {pipeline_mode = #tpu.pipeline_mode<synchronous>, transform_indices = @transform_4, window_bounds = array<i64: 33, 16>}, {transform_indices = @transform_5, window_bounds = array<i64: 1, 24, 16>}]} {
    %c0 = arith.constant 0 : index
    %c0_0 = arith.constant 0 : index
    %c0_1 = arith.constant 0 : index
    %0 = vector.load %arg1[%c0, %c0_0, %c0_1] : memref<1x24x8xf32, #tpu.memory_space<vmem>>, vector<1x24x8xf32>
    %1 = vector.shape_cast %0 : vector<1x24x8xf32> to vector<24x8xf32>
    %c0_2 = arith.constant 0 : index
    %c0_3 = arith.constant 0 : index
    %2 = vector.load %arg2[%c0_2, %c0_3] : memref<9x32xf32, #tpu.memory_space<vmem>>, vector<8x32xf32>
    %cst = arith.constant dense<0.000000e+00> : vector<24x32xf32>
    %3 = tpu.matmul %1, %2, %cst {dimension_numbers = #tpu.dot_dimension_numbers<[1], [0], [0], [1], [0, 0, 1, 1], [], []>} : vector<24x8xf32>, vector<8x32xf32>, vector<24x32xf32> -> vector<24x32xf32>
    %c8 = arith.constant 8 : index
    %c0_4 = arith.constant 0 : index
    %4 = vector.load %arg2[%c8, %c0_4] : memref<9x32xf32, #tpu.memory_space<vmem>>, vector<1x32xf32>
    %5 = vector.broadcast %4 : vector<1x32xf32> to vector<24x32xf32>
    %6 = arith.addf %3, %5 : vector<24x32xf32>
    %c0_5 = arith.constant 0 : index
    %c0_6 = arith.constant 0 : index
    %c0_7 = arith.constant 0 : index
    %7 = vector.load %arg3[%c0_5, %c0_6, %c0_7] : memref<2x32x32xf32, #tpu.memory_space<vmem>>, vector<1x32x32xf32>
    %8 = vector.shape_cast %7 : vector<1x32x32xf32> to vector<32x32xf32>
    %c0_8 = arith.constant 0 : index
    %c0_9 = arith.constant 0 : index
    %c0_10 = arith.constant 0 : index
    %9 = vector.load %arg4[%c0_8, %c0_9, %c0_10] : memref<2x4x32xf32, #tpu.memory_space<vmem>>, vector<1x4x32xf32>
    %10 = vector.shape_cast %9 : vector<1x4x32xf32> to vector<4x32xf32>
    %cst_11 = arith.constant dense<0.000000e+00> : vector<24x32xf32>
    %11 = tpu.matmul %6, %8, %cst_11 {dimension_numbers = #tpu.dot_dimension_numbers<[1], [0], [0], [1], [0, 0, 1, 1], [], []>} : vector<24x32xf32>, vector<32x32xf32>, vector<24x32xf32> -> vector<24x32xf32>
    %12 = vector.extract_strided_slice %10 {offsets = [0, 0], sizes = [1, 32], strides = [1, 1]} : vector<4x32xf32> to vector<1x32xf32>
    %13 = vector.broadcast %12 : vector<1x32xf32> to vector<24x32xf32>
    %14 = arith.addf %11, %13 : vector<24x32xf32>
    %cst_12 = arith.constant 0.000000e+00 : f32
    %15 = vector.broadcast %cst_12 : f32 to vector<24x32xf32>
    %16 = arith.cmpf oge, %14, %15 : vector<24x32xf32>
    %17 = vector.extract_strided_slice %10 {offsets = [1, 0], sizes = [1, 32], strides = [1, 1]} : vector<4x32xf32> to vector<1x32xf32>
    %18 = vector.broadcast %17 : vector<1x32xf32> to vector<24x32xf32>
    %19 = arith.mulf %18, %14 : vector<24x32xf32>
    %20 = arith.select %16, %14, %19 : vector<24x32xi1>, vector<24x32xf32>
    %21 = vector.shape_cast %20 : vector<24x32xf32> to vector<3x8x32xf32>
    %cst_13 = arith.constant dense<0.000000e+00> : vector<3x8xf32>
    %22 = vector.multi_reduction <add>, %21, %cst_13 [2] : vector<3x8x32xf32> to vector<3x8xf32>
    %23 = vector.shape_cast %22 : vector<3x8xf32> to vector<3x8x1xf32>
    %cst_14 = arith.constant dense<0.000000e+00> : vector<3x1xf32>
    %24 = vector.multi_reduction <add>, %23, %cst_14 [1] : vector<3x8x1xf32> to vector<3x1xf32>
    %25 = vector.shape_cast %24 : vector<3x1xf32> to vector<3x1x1xf32>
    %26 = arith.mulf %21, %21 : vector<3x8x32xf32>
    %cst_15 = arith.constant dense<0.000000e+00> : vector<3x8xf32>
    %27 = vector.multi_reduction <add>, %26, %cst_15 [2] : vector<3x8x32xf32> to vector<3x8xf32>
    %28 = vector.shape_cast %27 : vector<3x8xf32> to vector<3x8x1xf32>
    %cst_16 = arith.constant dense<0.000000e+00> : vector<3x1xf32>
    %29 = vector.multi_reduction <add>, %28, %cst_16 [1] : vector<3x8x1xf32> to vector<3x1xf32>
    %30 = vector.shape_cast %29 : vector<3x1xf32> to vector<3x1x1xf32>
    %cst_17 = arith.constant 3.906250e-03 : f32
    %31 = vector.broadcast %cst_17 : f32 to vector<3x1x1xf32>
    %32 = arith.mulf %25, %31 : vector<3x1x1xf32>
    %cst_18 = arith.constant 3.906250e-03 : f32
    %33 = vector.broadcast %cst_18 : f32 to vector<3x1x1xf32>
    %34 = arith.mulf %30, %33 : vector<3x1x1xf32>
    %35 = arith.mulf %32, %32 : vector<3x1x1xf32>
    %36 = arith.subf %34, %35 : vector<3x1x1xf32>
    %cst_19 = arith.constant 9.99999974E-6 : f32
    %37 = vector.broadcast %cst_19 : f32 to vector<3x1x1xf32>
    %38 = arith.addf %36, %37 : vector<3x1x1xf32>
    %39 = math.rsqrt %38 : vector<3x1x1xf32>
    %40 = vector.extract_strided_slice %10 {offsets = [2, 0], sizes = [1, 32], strides = [1, 1]} : vector<4x32xf32> to vector<1x32xf32>
    %41 = vector.shape_cast %40 : vector<1x32xf32> to vector<1x1x32xf32>
    %42 = vector.broadcast %39 : vector<3x1x1xf32> to vector<3x1x32xf32>
    %43 = vector.broadcast %41 : vector<1x1x32xf32> to vector<3x1x32xf32>
    %44 = arith.mulf %42, %43 : vector<3x1x32xf32>
    %45 = vector.broadcast %32 : vector<3x1x1xf32> to vector<3x8x32xf32>
    %46 = arith.subf %21, %45 : vector<3x8x32xf32>
    %47 = vector.broadcast %44 : vector<3x1x32xf32> to vector<3x8x32xf32>
    %48 = arith.mulf %46, %47 : vector<3x8x32xf32>
    %49 = vector.extract_strided_slice %10 {offsets = [3, 0], sizes = [1, 32], strides = [1, 1]} : vector<4x32xf32> to vector<1x32xf32>
    %50 = vector.shape_cast %49 : vector<1x32xf32> to vector<1x1x32xf32>
    %51 = vector.broadcast %50 : vector<1x1x32xf32> to vector<3x8x32xf32>
    %52 = arith.addf %48, %51 : vector<3x8x32xf32>
    %53 = vector.shape_cast %52 : vector<3x8x32xf32> to vector<24x32xf32>
    %54 = arith.addf %6, %53 : vector<24x32xf32>
    %c1 = arith.constant 1 : index
    %c0_20 = arith.constant 0 : index
    %c0_21 = arith.constant 0 : index
    %55 = vector.load %arg3[%c1, %c0_20, %c0_21] : memref<2x32x32xf32, #tpu.memory_space<vmem>>, vector<1x32x32xf32>
    %56 = vector.shape_cast %55 : vector<1x32x32xf32> to vector<32x32xf32>
    %c1_22 = arith.constant 1 : index
    %c0_23 = arith.constant 0 : index
    %c0_24 = arith.constant 0 : index
    %57 = vector.load %arg4[%c1_22, %c0_23, %c0_24] : memref<2x4x32xf32, #tpu.memory_space<vmem>>, vector<1x4x32xf32>
    %58 = vector.shape_cast %57 : vector<1x4x32xf32> to vector<4x32xf32>
    %cst_25 = arith.constant dense<0.000000e+00> : vector<24x32xf32>
    %59 = tpu.matmul %54, %56, %cst_25 {dimension_numbers = #tpu.dot_dimension_numbers<[1], [0], [0], [1], [0, 0, 1, 1], [], []>} : vector<24x32xf32>, vector<32x32xf32>, vector<24x32xf32> -> vector<24x32xf32>
    %60 = vector.extract_strided_slice %58 {offsets = [0, 0], sizes = [1, 32], strides = [1, 1]} : vector<4x32xf32> to vector<1x32xf32>
    %61 = vector.broadcast %60 : vector<1x32xf32> to vector<24x32xf32>
    %62 = arith.addf %59, %61 : vector<24x32xf32>
    %cst_26 = arith.constant 0.000000e+00 : f32
    %63 = vector.broadcast %cst_26 : f32 to vector<24x32xf32>
    %64 = arith.cmpf oge, %62, %63 : vector<24x32xf32>
    %65 = vector.extract_strided_slice %58 {offsets = [1, 0], sizes = [1, 32], strides = [1, 1]} : vector<4x32xf32> to vector<1x32xf32>
    %66 = vector.broadcast %65 : vector<1x32xf32> to vector<24x32xf32>
    %67 = arith.mulf %66, %62 : vector<24x32xf32>
    %68 = arith.select %64, %62, %67 : vector<24x32xi1>, vector<24x32xf32>
    %69 = vector.shape_cast %68 : vector<24x32xf32> to vector<3x8x32xf32>
    %cst_27 = arith.constant dense<0.000000e+00> : vector<3x8xf32>
    %70 = vector.multi_reduction <add>, %69, %cst_27 [2] : vector<3x8x32xf32> to vector<3x8xf32>
    %71 = vector.shape_cast %70 : vector<3x8xf32> to vector<3x8x1xf32>
    %cst_28 = arith.constant dense<0.000000e+00> : vector<3x1xf32>
    %72 = vector.multi_reduction <add>, %71, %cst_28 [1] : vector<3x8x1xf32> to vector<3x1xf32>
    %73 = vector.shape_cast %72 : vector<3x1xf32> to vector<3x1x1xf32>
    %74 = arith.mulf %69, %69 : vector<3x8x32xf32>
    %cst_29 = arith.constant dense<0.000000e+00> : vector<3x8xf32>
    %75 = vector.multi_reduction <add>, %74, %cst_29 [2] : vector<3x8x32xf32> to vector<3x8xf32>
    %76 = vector.shape_cast %75 : vector<3x8xf32> to vector<3x8x1xf32>
    %cst_30 = arith.constant dense<0.000000e+00> : vector<3x1xf32>
    %77 = vector.multi_reduction <add>, %76, %cst_30 [1] : vector<3x8x1xf32> to vector<3x1xf32>
    %78 = vector.shape_cast %77 : vector<3x1xf32> to vector<3x1x1xf32>
    %cst_31 = arith.constant 3.906250e-03 : f32
    %79 = vector.broadcast %cst_31 : f32 to vector<3x1x1xf32>
    %80 = arith.mulf %73, %79 : vector<3x1x1xf32>
    %cst_32 = arith.constant 3.906250e-03 : f32
    %81 = vector.broadcast %cst_32 : f32 to vector<3x1x1xf32>
    %82 = arith.mulf %78, %81 : vector<3x1x1xf32>
    %83 = arith.mulf %80, %80 : vector<3x1x1xf32>
    %84 = arith.subf %82, %83 : vector<3x1x1xf32>
    %cst_33 = arith.constant 9.99999974E-6 : f32
    %85 = vector.broadcast %cst_33 : f32 to vector<3x1x1xf32>
    %86 = arith.addf %84, %85 : vector<3x1x1xf32>
    %87 = math.rsqrt %86 : vector<3x1x1xf32>
    %88 = vector.extract_strided_slice %58 {offsets = [2, 0], sizes = [1, 32], strides = [1, 1]} : vector<4x32xf32> to vector<1x32xf32>
    %89 = vector.shape_cast %88 : vector<1x32xf32> to vector<1x1x32xf32>
    %90 = vector.broadcast %87 : vector<3x1x1xf32> to vector<3x1x32xf32>
    %91 = vector.broadcast %89 : vector<1x1x32xf32> to vector<3x1x32xf32>
    %92 = arith.mulf %90, %91 : vector<3x1x32xf32>
    %93 = vector.broadcast %80 : vector<3x1x1xf32> to vector<3x8x32xf32>
    %94 = arith.subf %69, %93 : vector<3x8x32xf32>
    %95 = vector.broadcast %92 : vector<3x1x32xf32> to vector<3x8x32xf32>
    %96 = arith.mulf %94, %95 : vector<3x8x32xf32>
    %97 = vector.extract_strided_slice %58 {offsets = [3, 0], sizes = [1, 32], strides = [1, 1]} : vector<4x32xf32> to vector<1x32xf32>
    %98 = vector.shape_cast %97 : vector<1x32xf32> to vector<1x1x32xf32>
    %99 = vector.broadcast %98 : vector<1x1x32xf32> to vector<3x8x32xf32>
    %100 = arith.addf %96, %99 : vector<3x8x32xf32>
    %101 = vector.shape_cast %100 : vector<3x8x32xf32> to vector<24x32xf32>
    %102 = arith.addf %54, %101 : vector<24x32xf32>
    %c0_34 = arith.constant 0 : index
    %c0_35 = arith.constant 0 : index
    %103 = vector.load %arg5[%c0_34, %c0_35] : memref<33x16xf32, #tpu.memory_space<vmem>>, vector<32x16xf32>
    %cst_36 = arith.constant dense<0.000000e+00> : vector<24x16xf32>
    %104 = tpu.matmul %102, %103, %cst_36 {dimension_numbers = #tpu.dot_dimension_numbers<[1], [0], [0], [1], [0, 0, 1, 1], [], []>} : vector<24x32xf32>, vector<32x16xf32>, vector<24x16xf32> -> vector<24x16xf32>
    %c32 = arith.constant 32 : index
    %c0_37 = arith.constant 0 : index
    %105 = vector.load %arg5[%c32, %c0_37] : memref<33x16xf32, #tpu.memory_space<vmem>>, vector<1x16xf32>
    %106 = vector.broadcast %105 : vector<1x16xf32> to vector<24x16xf32>
    %107 = arith.addf %104, %106 : vector<24x16xf32>
    %cst_38 = arith.constant 0.000000e+00 : f32
    %108 = vector.broadcast %cst_38 : f32 to vector<24x16xf32>
    %109 = arith.maximumf %107, %108 : vector<24x16xf32>
    %110 = math.absf %107 : vector<24x16xf32>
    %cst_39 = arith.constant 0.000000e+00 : f32
    %111 = vector.broadcast %cst_39 : f32 to vector<24x16xf32>
    %112 = arith.subf %111, %110 : vector<24x16xf32>
    %113 = math.exp %112 : vector<24x16xf32>
    %114 = math.log1p %113 : vector<24x16xf32>
    %115 = arith.addf %109, %114 : vector<24x16xf32>
    %cst_40 = arith.constant 9.99999997E-7 : f32
    %116 = vector.broadcast %cst_40 : f32 to vector<24x16xf32>
    %117 = arith.addf %115, %116 : vector<24x16xf32>
    %c0_41 = arith.constant 0 : index
    %c0_42 = arith.constant 0 : index
    %c0_43 = arith.constant 0 : index
    %118 = vector.load %arg6[%c0_41, %c0_42, %c0_43] : memref<1x24x16xf32, #tpu.memory_space<vmem>>, vector<1x24x16xf32>
    %119 = vector.shape_cast %118 : vector<1x24x16xf32> to vector<24x16xf32>
    %120 = vector.shape_cast %117 : vector<24x16xf32> to vector<1x24x16xf32>
    tpu.vector_store %arg6[%c0_41, %c0_42, %c0_43], %120 {strides = array<i32>} : memref<1x24x16xf32, #tpu.memory_space<vmem>>, vector<1x24x16xf32>,
    return
  }
  func.func @transform_0(%arg0: i32) -> (i32, i32, i32) {
    %c0_i32 = arith.constant 0 : i32
    %c0_i32_0 = arith.constant 0 : i32
    %c0_i32_1 = arith.constant 0 : i32
    return %arg0, %c0_i32, %c0_i32_0 : i32, i32, i32
  }
  func.func @transform_1(%arg0: i32) -> (i32, i32) {
    %c0_i32 = arith.constant 0 : i32
    %c0_i32_0 = arith.constant 0 : i32
    %c0_i32_1 = arith.constant 0 : i32
    return %c0_i32, %c0_i32_0 : i32, i32
  }
  func.func @transform_2(%arg0: i32) -> (i32, i32, i32) {
    %c0_i32 = arith.constant 0 : i32
    %c0_i32_0 = arith.constant 0 : i32
    %c0_i32_1 = arith.constant 0 : i32
    %c0_i32_2 = arith.constant 0 : i32
    return %c0_i32, %c0_i32_0, %c0_i32_1 : i32, i32, i32
  }
  func.func @transform_3(%arg0: i32) -> (i32, i32, i32) {
    %c0_i32 = arith.constant 0 : i32
    %c0_i32_0 = arith.constant 0 : i32
    %c0_i32_1 = arith.constant 0 : i32
    %c0_i32_2 = arith.constant 0 : i32
    return %c0_i32, %c0_i32_0, %c0_i32_1 : i32, i32, i32
  }
  func.func @transform_4(%arg0: i32) -> (i32, i32) {
    %c0_i32 = arith.constant 0 : i32
    %c0_i32_0 = arith.constant 0 : i32
    %c0_i32_1 = arith.constant 0 : i32
    return %c0_i32, %c0_i32_0 : i32, i32
  }
  func.func @transform_5(%arg0: i32) -> (i32, i32, i32) {
    %c0_i32 = arith.constant 0 : i32
    %c0_i32_0 = arith.constant 0 : i32
    %c0_i32_1 = arith.constant 0 : i32
    return %arg0, %c0_i32, %c0_i32_0 : i32, i32, i32
  }
}

</mosaic_0001>

<bundles_post_ra>
// kernel: tpu_custom_call.1
= control target key start
LH: loop header
LB: loop body
LE: loop exit
PB: predicated region body
PF: predicated region fallthrough
CT: control target
= control target key end

     0   :  { %s1156_s18 = smov 0   ;;  %s1394_s0 = inlined_call_operand.vmem [shape: f32[2,24,8], index: 0, kind: input, shape index: {}]   ;;  %s1395_s1 = inlined_call_operand.vmem [shape: f32[9,32], index: 1, kind: input, shape index: {}]   ;;  %s1396_s2 = inlined_call_operand.vmem [shape: f32[2,32,32], index: 2, kind: input, shape index: {}]   ;;  %s1397_s3 = inlined_call_operand.vmem [shape: f32[2,4,32], index: 3, kind: input, shape index: {}]   ;;  %s1398_s4 = inlined_call_operand.vmem [shape: f32[33,16], index: 4, kind: input, shape index: {}]   ;;  %s1399_s5 = inlined_call_operand.vmem [shape: f32[2,24,16], index: 5, kind: output, shape index: {}]  }
   0x1 LB: > { %s966_s19 = sadd.s32 4294967295, %s1122_s18   ;;  %p970_p0 = scmp.ge.s32.totalorder %s1122_s18, 1  ;;  %s1122_s18 = sphi %s1156_s18, %s15_s18  }
   0x2   : > { %p187_p1 = scmp.lt.s32.totalorder %s1122_s18, 3 }
   0x4   : > { %p188_p2 = pnand %p970_p0, %p187_p1 }
   0x5   : > { %p215_p3 = scmp.lt.s32.totalorder (!%p188_p2), %s966_s19, 1 }
   0x6   : > { %191 = sbr.rel (%p188_p2) target bundleno = 1223 (0x4c7), region = 40 }
   0xb   : > { %v228_v0 = vld [vmem:[%s1395_s1] sm:$0xff]  ;;  %v327_v1 = vld [vmem:[%s1396_s2 + $0x18] sm:$0xff]  ;;  %v1124_v2 = vmov 0.0   ;;  %vm1125_vm0 = vmmov 0   ;;  %s1401_s19 = smov (!%p215_p3, %s966_s19), 1  ;;  %v326_v3 = vld [vmem:[%s1396_s2 + $0x10] sm:$0xff]  ;;  %v329_v19 = vlaneseq }
   0xc   : > { %1019 = vmatprep.subr.mxu0 %v1124_v2  ;;  %1021 = vmatprep.mubr.msk.f32.mxu0 %vm1125_vm0, %v1124_v2  ;;  %s1081_s26 = smul.u32 24, %s1401_s19  ;;  %vm234_vm1 = vcmask 64512   ;;  %v325_v7 = vld [vmem:[%s1396_s2 + $0x8] sm:$0xff]  ;;  %v324_v8 = vld [vmem:[%s1396_s2] sm:$0xff]  ;;  %vm333_vm2 = vcmask 261120   ;;  %v983_v50 = vld [vmem:[%s1396_s2 + $0x38] sm:$0xff] }
   0xd   : > { %1020 = vmatpush3.msra.mxu0 %v228_v0  ;;  %1030 = vmatprep.subr.mxu1 %v1124_v2  ;;  %v973_v9 = vld [vmem:[%s1395_s1 + $0x8] ss:$0 sm:$0xff]  ;;  %v1225_v20 = vshrl.u32 %v329_v19, 7  ;;  %v1231_v22 = vld [vmem:[%s1397_s3] sm:$0xf]  ;;  %v982_v51 = vld [vmem:[%s1396_s2 + $0x30] sm:$0xff] }
   0xe   : > { %1031 = vmatpush3.msra.mxu1 %v327_v1  ;;  %1038 = vmatprep.mubr.msk.f32.mxu1 %vm1125_vm0, %v1124_v2  ;;  %s219_s29 = scalar_lea.vmem %s1394_s0, %s1081_s26  ;;  %v981_v52 = vld [vmem:[%s1396_s2 + $0x28] sm:$0xff]  ;;  %v980_v53 = vld [vmem:[%s1396_s2 + $0x20] sm:$0xff]  ;;  %s224_s13 = scalar_lea.vmem %s1399_s5, %s1081_s26  ;;  %vm907_vm10 = vcmask 130048  }
   0xf   : > { %1032 = vmatprep.subr.mxu1 %v1124_v2  ;;  %1047 = vmatprep.subr.mxu0 %v1124_v2  ;;  %v225_v4 = vld [vmem:[%s219_s29] sm:$0xff]  ;;  %v226_v5 = vld [vmem:[%s219_s29 + $0x8] sm:$0xff]  ;;  %v227_v6 = vld [vmem:[%s219_s29 + $0x10] sm:$0xff]  ;;  %v331_v21 = vsub.s32 0, %v1225_v20  ;;  %v428_v23 = vsub.s32 1, %v1225_v20 }
  0x10   : > { %1033 = vmatpush3.msra.mxu1 %v326_v3  ;;  %1022 = vmatmul.mubr.msk.f32.vlgmr.msra.gmra.mxu0 %vm234_vm1, %v225_v4 }
  0x11   : > { %1034 = vmatprep.subr.mxu1 %v1124_v2  ;;  %1024 = vmatprep.mubr.msk.f32.mxu0 %vm1125_vm0, %v1124_v2  ;;  %v332_v24 = vrot.slane %v1231_v22, %v331_v21  ;;  %v429_v25 = vrot.slane %v1231_v22, %v428_v23 }
  0x12   : > { %1035 = vmatpush3.msra.mxu1 %v325_v7  ;;  %1048 = vmatpush3.msra.mxu0 %v983_v50 }
  0x13   : > { %1036 = vmatprep.subr.mxu1 %v1124_v2  ;;  %1049 = vmatprep.subr.mxu0 %v1124_v2 }
  0x14   : > { %1025 = vmatmul.mubr.msk.f32.gmra.mxu0 %vm234_vm1, %v226_v5  ;;  %1037 = vmatpush3.msra.mxu1 %v324_v8 }
  0x15   : > { %1027 = vmatprep.mubr.msk.f32.mxu0 %vm1125_vm0, %v1124_v2  ;;  %1064 = vmatprep.subr.mxu1 %v1124_v2 }
  0x16   : > { %1050 = vmatpush3.msra.mxu0 %v982_v51 }
  0x17   : > { %1051 = vmatprep.subr.mxu0 %v1124_v2 }
  0x18   : > { %1028 = vmatmul.mubr.msk.f32.gmra.mxu0 %vm234_vm1, %v227_v6 }
  0x19   : > { %1055 = vmatprep.mubr.msk.f32.mxu0 %vm1125_vm0, %v1124_v2  ;;  %1052 = vmatpush3.msra.mxu0 %v981_v52 }
  0x1a   : > { %1053 = vmatprep.subr.mxu0 %v1124_v2 }
  0x1b   : > { %1054 = vmatpush3.msra.mxu0 %v980_v53 }
  0xd0   : > { %v310_v10 = vpop.f32.mrf.mxu0 }
  0xd1   : > { %v1207_v11 = vadd.f32 %v973_v9, %v310_v10 }
  0xd2   : > { %v1023_v12 = vpop.f32.mrf.mxu0 }
  0xd3   : > { %1039 = vmatmul.mubr.msk.f32.vlgmr.msra.gmra.mxu1 %vm333_vm2, %v1207_v11 }
  0xd4   : > { %v315_v13 = vpop.f32.mrf.mxu0  ;;  %1041 = vmatprep.mubr.msk.f32.mxu1 %vm1125_vm0, %v1124_v2 }
  0xd5   : > { %v1213_v14 = vadd.f32 %v973_v9, %v315_v13 }
  0xd6   : > { %v1026_v15 = vpop.f32.mrf.mxu0 }
  0xd7   : > { %1042 = vmatmul.mubr.msk.f32.gmra.mxu1 %vm333_vm2, %v1213_v14 }
  0xd8   : > { %v320_v16 = vpop.f32.mrf.mxu0  ;;  %1044 = vmatprep.mubr.msk.f32.mxu1 %vm1125_vm0, %v1124_v2 }
  0xd9   : > { %v1219_v17 = vadd.f32 %v973_v9, %v320_v16 }
  0xda   : > { %v1029_v18 = vpop.f32.mrf.mxu0 }
  0xdb   : > { %1045 = vmatmul.mubr.msk.f32.gmra.mxu1 %vm333_vm2, %v1219_v17 }
  0xdc   : > { %1072 = vmatprep.mubr.msk.f32.mxu1 %vm1125_vm0, %v1124_v2 }
 0x193   : > { %v409_v26 = vpop.f32.mrf.mxu1 }
 0x194   : > { %v410_v27 = vadd.f32 %v409_v26, %v332_v24 }
 0x195   : > { %v1040_v28 = vpop.f32.mrf.mxu1 }
 0x196   : > { %v430_v29 = vmul.f32 %v429_v25, %v410_v27  ;;  %vm423_vm3 = vcmp.ge.f32.partialorder %v410_v27, 0.0 }
 0x197   : > { %v414_v30 = vpop.f32.mrf.mxu1 }
 0x198   : > { %v415_v31 = vadd.f32 %v414_v30, %v332_v24  ;;  %v1240_v32 = vsel %vm423_vm3, %v410_v27, %v430_v29 }
 0x199   : > { %v1043_v33 = vpop.f32.mrf.mxu1  ;;  %v436_v34 = vsel %vm333_vm2, %v1240_v32, 0.0  ;;  %v463_v35 = vmul.f32 %v1240_v32, %v1240_v32 }
 0x19a   : > { %v431_v36 = vmul.f32 %v429_v25, %v415_v31  ;;  %437 = vadd.xlane.f32.xlu0 %v436_v34  ;;  %vm424_vm4 = vcmp.ge.f32.partialorder %v415_v31, 0.0 }
 0x19b   : > { %v419_v37 = vpop.f32.mrf.mxu1  ;;  %v466_v41 = vsel %vm333_vm2, %v463_v35, 0.0 }
 0x19c   : > { %v420_v38 = vadd.f32 %v419_v37, %v332_v24  ;;  %v1246_v39 = vsel %vm424_vm4, %v415_v31, %v431_v36 }
 0x19d   : > { %v1046_v40 = vpop.f32.mrf.mxu1  ;;  %v439_v42 = vsel %vm333_vm2, %v1246_v39, 0.0  ;;  %v464_v43 = vmul.f32 %v1246_v39, %v1246_v39 }
 0x19e   : > { %v432_v44 = vmul.f32 %v429_v25, %v420_v38  ;;  %467 = vadd.xlane.f32.xlu0 %v466_v41  ;;  %440 = vadd.xlane.f32.xlu1 %v439_v42  ;;  %vm425_vm5 = vcmp.ge.f32.partialorder %v420_v38, 0.0 }
 0x19f   : > { %v469_v46 = vsel %vm333_vm2, %v464_v43, 0.0 }
 0x1a0   : > { %v1253_v45 = vsel %vm425_vm5, %v420_v38, %v432_v44 }
 0x1a1   : > { %v442_v47 = vsel %vm333_vm2, %v1253_v45, 0.0  ;;  %v465_v48 = vmul.f32 %v1253_v45, %v1253_v45 }
 0x1a2   : > { %470 = vadd.xlane.f32.xlu1 %v469_v46  ;;  %443 = vadd.xlane.f32.xlu0 %v442_v47 }
 0x1a3   : > { %v472_v49 = vsel %vm333_vm2, %v465_v48, 0.0 }
 0x1a6   : > { %473 = vadd.xlane.f32.xlu1 %v472_v49 }
 0x223   : > { %v438_v54 = vpop.xlane.xlu0 %437 }
 0x224   : > { %v445_v55 = vrot.slane %v438_v54, 4 }
 0x226   : > { %v446_v56 = vadd.f32 %v445_v55, %v438_v54 }
 0x227   : > { %v468_v57 = vpop.xlane.xlu0 %467  ;;  %v441_v58 = vpop.xlane.xlu1 %440 }
 0x228   : > { %v447_v59 = vrot.slane %v446_v56, 2  ;;  %v475_v60 = vrot.slane %v468_v57, 4  ;;  %v451_v61 = vrot.slane %v441_v58, 4 }
 0x22a   : > { %v448_v62 = vadd.f32 %v447_v59, %v446_v56  ;;  %v476_v63 = vadd.f32 %v475_v60, %v468_v57  ;;  %v452_v0 = vadd.f32 %v451_v61, %v441_v58  ;;  %v1277_v58 = vsub.s32 2, %v1225_v20 }
 0x22b   : > { %v471_v1 = vpop.xlane.xlu1 %470  ;;  %v444_v3 = vpop.xlane.xlu0 %443  ;;  %v534_v59 = vsub.s32 3, %v1225_v20 }
 0x22c   : > { %v449_v4 = vrot.slane %v448_v62, 1  ;;  %v477_v5 = vrot.slane %v476_v63, 2  ;;  %v453_v6 = vrot.slane %v452_v0, 2  ;;  %v481_v7 = vrot.slane %v471_v1, 4 }
 0x22d   : > { %v457_v8 = vrot.slane %v444_v3, 4 }
 0x22e   : > { %v450_v9 = vadd.f32 %v449_v4, %v448_v62  ;;  %v478_v10 = vadd.f32 %v477_v5, %v476_v63  ;;  %v454_v12 = vadd.f32 %v453_v6, %v452_v0  ;;  %v482_v13 = vadd.f32 %v481_v7, %v471_v1 }
 0x22f   : > { %v458_v15 = vadd.f32 %v457_v8, %v444_v3  ;;  %v474_v16 = vpop.xlane.xlu1 %473  ;;  %v535_v62 = vrot.slane %v1231_v22, %v534_v59 }
 0x230   : > { %v493_v18 = vmul.f32 0.00390625, %v450_v9  ;;  %v479_v19 = vrot.slane %v478_v10, 1  ;;  %v455_v24 = vrot.slane %v454_v12, 1  ;;  %v483_v25 = vrot.slane %v482_v13, 2 }
 0x231   : > { %v459_v26 = vrot.slane %v458_v15, 2  ;;  %v487_v27 = vrot.slane %v474_v16, 4 }
 0x232   : > { %v480_v28 = vadd.f32 %v479_v19, %v478_v10  ;;  %v456_v29 = vadd.f32 %v455_v24, %v454_v12  ;;  %v484_v30 = vadd.f32 %v483_v25, %v482_v13  ;;  %v499_v34 = vmul.f32 %v493_v18, %v493_v18 }
 0x233   : > { %v460_v31 = vadd.f32 %v459_v26, %v458_v15  ;;  %v488_v33 = vadd.f32 %v487_v27, %v474_v16  ;;  %v514_v63 = vsub.f32 %v1240_v32, %v493_v18 }
 0x234   : > { %v496_v35 = vmul.f32 0.00390625, %v480_v28  ;;  %v494_v36 = vmul.f32 0.00390625, %v456_v29  ;;  %v485_v37 = vrot.slane %v484_v30, 1 }
 0x235   : > { %v461_v38 = vrot.slane %v460_v31, 1  ;;  %v489_v40 = vrot.slane %v488_v33, 2 }
 0x236   : > { %v502_v41 = vsub.f32 %v496_v35, %v499_v34  ;;  %v486_v42 = vadd.f32 %v485_v37, %v484_v30  ;;  %v500_v47 = vmul.f32 %v494_v36, %v494_v36  ;;  %v515_v6 = vsub.f32 %v1246_v39, %v494_v36 }
 0x237   : > { %v462_v43 = vadd.f32 %v461_v38, %v460_v31  ;;  %v490_v44 = vadd.f32 %v489_v40, %v488_v33 }
 0x238   : > { %v505_v46 = vadd.f32 1e-05, %v502_v41  ;;  %v497_v48 = vmul.f32 0.00390625, %v486_v42 }
 0x239   : > { %v495_v49 = vmul.f32 0.00390625, %v462_v43  ;;  %v491_v50 = vrot.slane %v490_v44, 1 }
 0x23a   : > { %1092 = vrsqrt.f32 %v505_v46  ;;  %v503_v51 = vsub.f32 %v497_v48, %v500_v47  ;;  %v764_v47 = vld [vmem:[%s1398_s4 + $0x18] sm:$0xff]  ;;  %v763_v48 = vld [vmem:[%s1398_s4 + $0x10] sm:$0xff] }
 0x23b   : > { %v492_v52 = vadd.f32 %v491_v50, %v490_v44  ;;  %v501_v54 = vmul.f32 %v495_v49, %v495_v49  ;;  %v516_v32 = vsub.f32 %v1253_v45, %v495_v49  ;;  %v1314_v45 = vld [vmem:[%s1397_s3 + $0x4] sm:$0xf]  ;;  %1065 = vmatpush3.msra.mxu1 %v764_v47  ;;  %v762_v49 = vld [vmem:[%s1398_s4 + $0x8] sm:$0xff] }
 0x23c   : > { %v506_v53 = vadd.f32 1e-05, %v503_v51  ;;  %v648_v18 = vrot.slane %v1314_v45, %v428_v23  ;;  %1066 = vmatprep.subr.mxu1 %v1124_v2  ;;  %v761_v50 = vld [vmem:[%s1398_s4] sm:$0xff] }
 0x23d   : > { %v498_v55 = vmul.f32 0.00390625, %v492_v52  ;;  %1067 = vmatpush3.msra.mxu1 %v763_v48 }
 0x23e   : > { %1094 = vrsqrt.f32 %v506_v53  ;;  %1068 = vmatprep.subr.mxu1 %v1124_v2 }
 0x23f   : > { %v504_v56 = vsub.f32 %v498_v55, %v501_v54  ;;  %1069 = vmatpush3.msra.mxu1 %v762_v49 }
 0x240   : > { %1070 = vmatprep.subr.mxu1 %v1124_v2 }
 0x241   : > { %v507_v57 = vadd.f32 1e-05, %v504_v56  ;;  %1071 = vmatpush3.msra.mxu1 %v761_v50 }
 0x243   : > { %1096 = vrsqrt.f32 %v507_v57 }
 0x247   : > { %v1093_v60 = vpop.eup %1092 }
 0x248   : > { %v511_v61 = vmul.f32 %v1093_v60, %v1231_v22 }
 0x24a   : > { %v520_v0 = vrot.slane %v511_v61, %v1277_v58 }
 0x24b   : > { %v1095_v1 = vpop.eup %1094 }
 0x24c   : > { %v529_v3 = vmul.f32 %v520_v0, %v514_v63  ;;  %v512_v4 = vmul.f32 %v1095_v1, %v1231_v22 }
 0x24e   : > { %v536_v5 = vadd.f32 %v535_v62, %v529_v3  ;;  %v524_v7 = vrot.slane %v512_v4, %v1277_v58 }
 0x250   : > { %v1097_v8 = vpop.eup %1096  ;;  %v1290_v9 = vadd.f32 %v536_v5, %v1207_v11  ;;  %v530_v10 = vmul.f32 %v524_v7, %v515_v6 }
 0x251   : > { %v513_v12 = vmul.f32 %v1097_v8, %v1231_v22 }
 0x252   : > { %1056 = vmatmul.mubr.msk.f32.vlgmr.msra.gmra.mxu0 %vm333_vm2, %v1290_v9  ;;  %v537_v13 = vadd.f32 %v535_v62, %v530_v10 }
 0x253   : > { %1058 = vmatprep.mubr.msk.f32.mxu0 %vm1125_vm0, %v1124_v2  ;;  %v528_v39 = vrot.slane %v513_v12, %v1277_v58 }
 0x254   : > { %v1300_v15 = vadd.f32 %v537_v13, %v1213_v14  ;;  %v552_v14 = vrot.slane %v1314_v45, %v331_v21 }
 0x255   : > { %v531_v16 = vmul.f32 %v528_v39, %v516_v32 }
 0x256   : > { %1059 = vmatmul.mubr.msk.f32.gmra.mxu0 %vm333_vm2, %v1300_v15 }
 0x257   : > { %v538_v11 = vadd.f32 %v535_v62, %v531_v16  ;;  %1061 = vmatprep.mubr.msk.f32.mxu0 %vm1125_vm0, %v1124_v2 }
 0x259   : > { %v1307_v22 = vadd.f32 %v538_v11, %v1219_v17 }
 0x25b   : > { %1062 = vmatmul.mubr.msk.f32.gmra.mxu0 %vm333_vm2, %v1307_v22 }
 0x312   : > { %v628_v19 = vpop.f32.mrf.mxu0 }
 0x313   : > { %v629_v24 = vadd.f32 %v628_v19, %v552_v14 }
 0x314   : > { %v1057_v17 = vpop.f32.mrf.mxu0 }
 0x315   : > { %v649_v25 = vmul.f32 %v648_v18, %v629_v24  ;;  %vm642_vm6 = vcmp.ge.f32.partialorder %v629_v24, 0.0 }
 0x316   : > { %v633_v26 = vpop.f32.mrf.mxu0 }
 0x317   : > { %v1322_v27 = vsel %vm642_vm6, %v629_v24, %v649_v25  ;;  %v634_v28 = vadd.f32 %v633_v26, %v552_v14 }
 0x318   : > { %v655_v29 = vsel %vm333_vm2, %v1322_v27, 0.0  ;;  %v682_v30 = vmul.f32 %v1322_v27, %v1322_v27  ;;  %v1060_v21 = vpop.f32.mrf.mxu0 }
 0x319   : > { %656 = vadd.xlane.f32.xlu0 %v655_v29  ;;  %v650_v31 = vmul.f32 %v648_v18, %v634_v28  ;;  %vm643_vm7 = vcmp.ge.f32.partialorder %v634_v28, 0.0 }
 0x31a   : > { %v685_v23 = vsel %vm333_vm2, %v682_v30, 0.0 }
 0x31b   : > { %v638_v33 = vpop.f32.mrf.mxu0  ;;  %686 = vadd.xlane.f32.xlu1 %v685_v23  ;;  %v1329_v35 = vsel %vm643_vm7, %v634_v28, %v650_v31 }
 0x31c   : > { %v639_v34 = vadd.f32 %v638_v33, %v552_v14  ;;  %v658_v37 = vsel %vm333_vm2, %v1329_v35, 0.0  ;;  %v683_v38 = vmul.f32 %v1329_v35, %v1329_v35 }
 0x31d   : > { %v1063_v36 = vpop.f32.mrf.mxu0  ;;  %659 = vadd.xlane.f32.xlu0 %v658_v37 }
 0x31e   : > { %v651_v40 = vmul.f32 %v648_v18, %v639_v34  ;;  %vm644_vm8 = vcmp.ge.f32.partialorder %v639_v34, 0.0  ;;  %v688_v41 = vsel %vm333_vm2, %v683_v38, 0.0 }
 0x31f   : > { %689 = vadd.xlane.f32.xlu1 %v688_v41 }
 0x320   : > { %v1336_v42 = vsel %vm644_vm8, %v639_v34, %v651_v40 }
 0x321   : > { %v661_v43 = vsel %vm333_vm2, %v1336_v42, 0.0  ;;  %v684_v44 = vmul.f32 %v1336_v42, %v1336_v42 }
 0x322   : > { %662 = vadd.xlane.f32.xlu0 %v661_v43 }
 0x323   : > { %v691_v46 = vsel %vm333_vm2, %v684_v44, 0.0 }
 0x324   : > { %692 = vadd.xlane.f32.xlu1 %v691_v46 }
 0x3a2   : > { %v657_v51 = vpop.xlane.xlu0 %656 }
 0x3a3   : > { %v664_v52 = vrot.slane %v657_v51, 4 }
 0x3a4   : > { %v687_v53 = vpop.xlane.xlu1 %686 }
 0x3a5   : > { %v665_v54 = vadd.f32 %v664_v52, %v657_v51  ;;  %v694_v55 = vrot.slane %v687_v53, 4 }
 0x3a6   : > { %v660_v60 = vpop.xlane.xlu0 %659 }
 0x3a7   : > { %v666_v56 = vrot.slane %v665_v54, 2  ;;  %v695_v57 = vadd.f32 %v694_v55, %v687_v53  ;;  %v670_v61 = vrot.slane %v660_v60, 4 }
 0x3a8   : > { %v690_v0 = vpop.xlane.xlu1 %689 }
 0x3a9   : > { %v667_v62 = vadd.f32 %v666_v56, %v665_v54  ;;  %v696_v63 = vrot.slane %v695_v57, 2  ;;  %v671_v1 = vadd.f32 %v670_v61, %v660_v60  ;;  %v700_v3 = vrot.slane %v690_v0, 4 }
 0x3ab   : > { %v668_v4 = vrot.slane %v667_v62, 1  ;;  %v697_v5 = vadd.f32 %v696_v63, %v695_v57  ;;  %v663_v6 = vpop.xlane.xlu0 %662  ;;  %v672_v7 = vrot.slane %v671_v1, 2  ;;  %v701_v8 = vadd.f32 %v700_v3, %v690_v0 }
 0x3ac   : > { %v676_v10 = vrot.slane %v663_v6, 4  ;;  %v754_v57 = vrot.slane %v1314_v45, %v534_v59 }
 0x3ad   : > { %v669_v12 = vadd.f32 %v668_v4, %v667_v62  ;;  %v698_v32 = vrot.slane %v697_v5, 1  ;;  %v693_v13 = vpop.xlane.xlu1 %692  ;;  %v673_v39 = vadd.f32 %v672_v7, %v671_v1  ;;  %v702_v16 = vrot.slane %v701_v8, 2 }
 0x3ae   : > { %v677_v11 = vadd.f32 %v676_v10, %v663_v6  ;;  %v706_v14 = vrot.slane %v693_v13, 4 }
 0x3af   : > { %v712_v18 = vmul.f32 0.00390625, %v669_v12  ;;  %v699_v19 = vadd.f32 %v698_v32, %v697_v5  ;;  %v674_v24 = vrot.slane %v673_v39, 1  ;;  %v703_v17 = vadd.f32 %v702_v16, %v701_v8 }
 0x3b0   : > { %v678_v25 = vrot.slane %v677_v11, 2  ;;  %v707_v26 = vadd.f32 %v706_v14, %v693_v13 }
 0x3b1   : > { %v718_v28 = vmul.f32 %v712_v18, %v712_v18  ;;  %v715_v29 = vmul.f32 0.00390625, %v699_v19  ;;  %v675_v30 = vadd.f32 %v674_v24, %v673_v39  ;;  %v704_v21 = vrot.slane %v703_v17, 1 }
 0x3b2   : > { %v679_v31 = vadd.f32 %v678_v25, %v677_v11  ;;  %v708_v23 = vrot.slane %v707_v26, 2  ;;  %v733_v60 = vsub.f32 %v1322_v27, %v712_v18 }
 0x3b3   : > { %v721_v33 = vsub.f32 %v715_v29, %v718_v28  ;;  %v713_v34 = vmul.f32 0.00390625, %v675_v30  ;;  %v705_v36 = vadd.f32 %v704_v21, %v703_v17 }
 0x3b4   : > { %v680_v37 = vrot.slane %v679_v31, 1  ;;  %v709_v38 = vadd.f32 %v708_v23, %v707_v26 }
 0x3b5   : > { %v724_v40 = vadd.f32 1e-05, %v721_v33  ;;  %v719_v41 = vmul.f32 %v713_v34, %v713_v34  ;;  %v716_v43 = vmul.f32 0.00390625, %v705_v36  ;;  %v734_v3 = vsub.f32 %v1329_v35, %v713_v34 }
 0x3b6   : > { %v681_v44 = vadd.f32 %v680_v37, %v679_v31  ;;  %v710_v46 = vrot.slane %v709_v38, 1 }
 0x3b7   : > { %1098 = vrsqrt.f32 %v724_v40  ;;  %v722_v47 = vsub.f32 %v716_v43, %v719_v41 }
 0x3b8   : > { %v714_v48 = vmul.f32 0.00390625, %v681_v44  ;;  %v711_v49 = vadd.f32 %v710_v46, %v709_v38 }
 0x3b9   : > { %v725_v50 = vadd.f32 1e-05, %v722_v47 }
 0x3ba   : > { %v720_v51 = vmul.f32 %v714_v48, %v714_v48  ;;  %v717_v52 = vmul.f32 0.00390625, %v711_v49  ;;  %v735_v27 = vsub.f32 %v1336_v42, %v714_v48 }
 0x3bb   : > { %1100 = vrsqrt.f32 %v725_v50 }
 0x3bc   : > { %v723_v53 = vsub.f32 %v717_v52, %v720_v51 }
 0x3be   : > { %v726_v54 = vadd.f32 1e-05, %v723_v53 }
 0x3c0   : > { %1102 = vrsqrt.f32 %v726_v54 }
 0x3c4   : > { %v1099_v55 = vpop.eup %1098 }
 0x3c5   : > { %v730_v56 = vmul.f32 %v1099_v55, %v1314_v45 }
 0x3c7   : > { %v739_v61 = vrot.slane %v730_v56, %v1277_v58 }
 0x3c8   : > { %v1101_v62 = vpop.eup %1100 }
 0x3c9   : > { %v748_v63 = vmul.f32 %v739_v61, %v733_v60  ;;  %v731_v0 = vmul.f32 %v1101_v62, %v1314_v45 }
 0x3cb   : > { %v755_v1 = vadd.f32 %v754_v57, %v748_v63  ;;  %v743_v4 = vrot.slane %v731_v0, %v1277_v58 }
 0x3cd   : > { %v758_v5 = vadd.f32 %v755_v1, %v1290_v9  ;;  %v1103_v6 = vpop.eup %1102  ;;  %v749_v7 = vmul.f32 %v743_v4, %v734_v3 }
 0x3ce   : > { %v732_v20 = vmul.f32 %v1103_v6, %v1314_v45  ;;  %v988_v45 = vld [vmem:[%s1398_s4 + $0x20] ss:$0 sm:$0xff] }
 0x3cf   : > { %1073 = vmatmul.mubr.msk.f32.vlgmr.msra.gmra.mxu1 %vm333_vm2, %v758_v5  ;;  %v756_v59 = vadd.f32 %v754_v57, %v749_v7 }
 0x3d0   : > { %1075 = vmatprep.mubr.msk.f32.mxu1 %vm1125_vm0, %v1124_v2  ;;  %v747_v8 = vrot.slane %v732_v20, %v1277_v58 }
 0x3d1   : > { %v759_v35 = vadd.f32 %v756_v59, %v1300_v15 }
 0x3d2   : > { %v750_v10 = vmul.f32 %v747_v8, %v735_v27 }
 0x3d3   : > { %1076 = vmatmul.mubr.msk.f32.gmra.mxu1 %vm333_vm2, %v759_v35 }
 0x3d4   : > { %1078 = vmatprep.mubr.msk.f32.mxu1 %vm1125_vm0, %v1124_v2  ;;  %v757_v9 = vadd.f32 %v754_v57, %v750_v10 }
 0x3d6   : > { %v760_v12 = vadd.f32 %v757_v9, %v1307_v22 }
 0x3d8   : > { %1079 = vmatmul.mubr.msk.f32.gmra.mxu1 %vm333_vm2, %v760_v12 }
 0x48f   : > { %v845_v42 = vpop.f32.mrf.mxu1 }
 0x490   : > { %v846_v32 = vadd.f32 %v988_v45, %v845_v42 }
 0x491   : > { %v1074_v58 = vpop.f32.mrf.mxu1 }
 0x492   : > { %v862_v13 = vand.u32 2147483647, %v846_v32  ;;  %v859_v44 = vmax.f32 %v846_v32, 0.0 }
 0x493   : > { %v850_v39 = vpop.f32.mrf.mxu1 }
 0x494   : > { %v865_v15 = vsub.f32 0.0, %v862_v13  ;;  %v851_v16 = vadd.f32 %v988_v45, %v850_v39 }
 0x495   : > { %v1077_v14 = vpop.f32.mrf.mxu1 }
 0x496   : > { %v868_v11 = vmul.f32 1.442695, %v865_v15  ;;  %v863_v18 = vand.u32 2147483647, %v851_v16  ;;  %v860_v55 = vmax.f32 %v851_v16, 0.0 }
 0x498   : > { %1104 = vpow2.f32 %v868_v11  ;;  %v866_v2 = vsub.f32 0.0, %v863_v18  ;;  %v855_v19 = vpop.f32.mrf.mxu1 }
 0x499   : > { %v856_v22 = vadd.f32 %v988_v45, %v855_v19 }
 0x49a   : > { %v870_v24 = vmul.f32 1.442695, %v866_v2  ;;  %v1080_v17 = vpop.f32.mrf.mxu1 }
 0x49b   : > { %v864_v25 = vand.u32 2147483647, %v856_v22  ;;  %v861_v3 = vmax.f32 %v856_v22, 0.0 }
 0x49c   : > { %1106 = vpow2.f32 %v870_v24 }
 0x49d   : > { %v867_v26 = vsub.f32 0.0, %v864_v25 }
 0x49f   : > { %v872_v28 = vmul.f32 1.442695, %v867_v26 }
 0x4a1   : > { %1108 = vpow2.f32 %v872_v28 }
 0x4a5   : > { %v1105_v29 = vpop.eup %1104 }
 0x4a6   : > { %v874_v30 = vadd.f32 1.0, %v1105_v29  ;;  %v877_v23 = vmul.f32 -0.5, %v1105_v29  ;;  %v880_v37 = vand.u32 2147483647, %v1105_v29 }
 0x4a8   : > { %1110 = vlog2.f32 %v874_v30  ;;  %v878_v36 = vadd.f32 1.0, %v877_v23  ;;  %vm881_vm9 = vcmp.lt.f32.partialorder %v880_v37, 0.0004427343 }
 0x4a9   : > { %v1107_v21 = vpop.eup %1106 }
 0x4aa   : > { %v883_v31 = vadd.f32 1.0, %v1107_v21  ;;  %v886_v38 = vmul.f32 -0.5, %v1107_v21  ;;  %v879_v43 = vmul.f32 %v1105_v29, %v878_v36  ;;  %v889_v48 = vand.u32 2147483647, %v1107_v21 }
 0x4ac   : > { %1112 = vlog2.f32 %v883_v31  ;;  %v887_v46 = vadd.f32 1.0, %v886_v38  ;;  %vm890_vm11 = vcmp.lt.f32.partialorder %v889_v48, 0.0004427343 }
 0x4ae   : > { %v1109_v33 = vpop.eup %1108  ;;  %v888_v54 = vmul.f32 %v1107_v21, %v887_v46 }
 0x4af   : > { %v892_v34 = vadd.f32 1.0, %v1109_v33  ;;  %v895_v49 = vmul.f32 -0.5, %v1109_v33  ;;  %v898_v60 = vand.u32 2147483647, %v1109_v33 }
 0x4b1   : > { %1114 = vlog2.f32 %v892_v34  ;;  %v896_v56 = vadd.f32 1.0, %v895_v49  ;;  %vm899_vm12 = vcmp.lt.f32.partialorder %v898_v60, 0.0004427343 }
 0x4b3   : > { %v897_v1 = vmul.f32 %v1109_v33, %v896_v56 }
 0x4b5   : > { %v1111_v40 = vpop.eup %1110 }
 0x4b6   : > { %v876_v41 = vmul.f32 0.6931472, %v1111_v40 }
 0x4b8   : > { %v882_v47 = vsel %vm881_vm9, %v879_v43, %v876_v41 }
 0x4b9   : > { %v901_v50 = vadd.f32 %v882_v47, %v859_v44  ;;  %v1113_v51 = vpop.eup %1112 }
 0x4ba   : > { %v885_v53 = vmul.f32 0.6931472, %v1113_v51 }
 0x4bb   : > { %v904_v52 = vadd.f32 1e-06, %v901_v50 }
 0x4bc   : > { %v891_v57 = vsel %vm890_vm11, %v888_v54, %v885_v53 }
 0x4bd   : > { %908 = vst.msk [vmem:[%s224_s13] sm:$0xff] %vm907_vm10, %v904_v52  ;;  %v902_v61 = vadd.f32 %v891_v57, %v860_v55 }
 0x4be   : > { %v1115_v62 = vpop.eup %1114 }
 0x4bf   : > { %v905_v63 = vadd.f32 1e-06, %v902_v61  ;;  %v894_v0 = vmul.f32 0.6931472, %v1115_v62 }
 0x4c1   : > { %909 = vst.msk [vmem:[%s224_s13 + $0x8] sm:$0xff] %vm907_vm10, %v905_v63  ;;  %v900_v4 = vsel %vm899_vm12, %v897_v1, %v894_v0 }
 0x4c2   : > { %v903_v5 = vadd.f32 %v900_v4, %v861_v3 }
 0x4c4   : > { %v906_v6 = vadd.f32 1e-06, %v903_v5 }
 0x4c6   : > { %910 = vst.msk [vmem:[%s224_s13 + $0x10] sm:$0xff] %vm907_vm10, %v906_v6 }
 0x4c7 PF: > { %s15_s18 = sadd.s32 1, %s1122_s18  }
 0x4c8   : > { %p12_p4 = scmp.ge.s32.totalorder %s15_s18, 4  }
 0x4ca   :  { %14 = sbr.rel (!%p12_p4) target bundleno = 1 (0x1), region = 72 }

</bundles_post_ra>
